<compile_context>
chip_gen: v7x
topology: tpu7x:2x2x1
jax: 0.10.0
libtpu: 0.0.40
codegen_flags: <defaults>
</compile_context>

<pallas_src>
import math

import jax
import jax.numpy as jnp
from jax import lax
from jax.experimental import pallas as pl
from jax.experimental.pallas import tpu as pltpu

_EPS = 1e-15      # geoopt Sphere.projx clamp_min on the norm
_LANES = 128      # TPU lane width


def _choose_tile_rows(n_rows, row_bytes):
    """Pick a row tile ~1 MiB per block (x/u/out x 2 buffers ~ 6 MiB VMEM)."""
    target_block_bytes = 1 << 20
    tm = max(8, min(4096, target_block_bytes // max(row_bytes, 1)))
    tm = (tm // 8) * 8                      # keep sublane (8) divisibility
    if tm >= n_rows:
        return n_rows                       # single full block is always legal
    return tm


def _retraction_kernel_rows(x_ref, u_ref, o_ref):
    """One point per row: add (VPU), row reduce (XLU), rsqrt (EUP), scale."""
    y = x_ref[...].astype(jnp.float32) + u_ref[...].astype(jnp.float32)
    sq = jnp.sum(y * y, axis=-1, keepdims=True)
    inv = lax.rsqrt(jnp.maximum(sq, _EPS * _EPS))
    o_ref[...] = (y * inv).astype(o_ref.dtype)


def _retraction_kernel_packed(x_ref, u_ref, seg_ref, o_ref):
    """g = 128 // D points packed per 128-lane row (lane-dense loads/stores).

    The per-point (D-lane segment) sum of squares is computed and broadcast
    back across its segment with a block-diagonal-ones matmul on the MXU.
    y*y is split into a bf16-exact high part plus a small residual so the
    result keeps ~f32 accuracy regardless of the MXU's f32 pass count.
    """
    y = x_ref[...].astype(jnp.float32) + u_ref[...].astype(jnp.float32)
    y2 = y * y
    hi = y2.astype(jnp.bfloat16).astype(jnp.float32)
    lo = y2 - hi
    seg = seg_ref[...]
    sq = (jnp.dot(hi, seg, preferred_element_type=jnp.float32) +
          jnp.dot(lo, seg, preferred_element_type=jnp.float32))
    inv = lax.rsqrt(jnp.maximum(sq, _EPS * _EPS))
    o_ref[...] = (y * inv).astype(o_ref.dtype)


def retraction(x, u):
    """Sphere retraction: (x + u) normalized along the last axis."""
    assert x.shape == u.shape, "x and u must have identical shapes"
    orig_shape = x.shape
    D = int(orig_shape[-1])
    N = int(math.prod(orig_shape[:-1]))
    itemsize = jnp.dtype(x.dtype).itemsize

    g = _LANES // D if (0 < D < _LANES and _LANES % D == 0) else 1

    if g > 1 and N >= g and N % g == 0:
        # ---- lane-dense packed path (small ambient dim) -------------------
        W = g * D
        rows = N // g
        x2 = x.reshape(rows, W)             # free: row-major contiguous
        u2 = u.reshape(rows, W)
        lane_seg = jnp.arange(W) // D
        seg = (lane_seg[:, None] == lane_seg[None, :]).astype(jnp.float32)

        tm = _choose_tile_rows(rows, W * itemsize)
        grid = (pl.cdiv(rows, tm),)         # ragged tail handled by Pallas

        out = pl.pallas_call(
            _retraction_kernel_packed,
            out_shape=jax.ShapeDtypeStruct((rows, W), x.dtype),
            grid_spec=pltpu.PrefetchScalarGridSpec(
                num_scalar_prefetch=0,
                grid=grid,
                in_specs=[
                    pl.BlockSpec((tm, W), lambda i: (i, 0)),
                    pl.BlockSpec((tm, W), lambda i: (i, 0)),
                    # constant block index -> fetched once, stays resident
                    pl.BlockSpec((W, W), lambda i: (0, 0)),
                ],
                out_specs=pl.BlockSpec((tm, W), lambda i: (i, 0)),
            ),
            compiler_params=pltpu.CompilerParams(
                dimension_semantics=("parallel",)),
        )(x2, u2, seg)
        return out.reshape(orig_shape)

    # ---- general path (D >= 128, or packing not applicable) ---------------
    x2 = x.reshape(N, D)
    u2 = u.reshape(N, D)
    tm = _choose_tile_rows(N, D * itemsize)
    grid = (pl.cdiv(N, tm),)                # no concatenate padding

    out = pl.pallas_call(
        _retraction_kernel_rows,
        out_shape=jax.ShapeDtypeStruct((N, D), x.dtype),
        grid_spec=pltpu.PrefetchScalarGridSpec(
            num_scalar_prefetch=0,
            grid=grid,
            in_specs=[
                pl.BlockSpec((tm, D), lambda i: (i, 0)),
                pl.BlockSpec((tm, D), lambda i: (i, 0)),
            ],
            out_specs=pl.BlockSpec((tm, D), lambda i: (i, 0)),
        ),
        compiler_params=pltpu.CompilerParams(
            dimension_semantics=("parallel",)),
    )(x2, u2)
    return out.reshape(orig_shape)


def _reference(x, u):
    y = x + u
    n = jnp.linalg.norm(y, axis=-1, keepdims=True)
    return y / jnp.maximum(n, _EPS)


if __name__ == "__main__":
    key = jax.random.PRNGKey(0)

    def make_inputs(k, shape):
        kx, ku = jax.random.split(k)
        x_raw = jax.random.normal(kx, shape, dtype=jnp.float32)
        # Points already on the sphere (as the module would receive).
        x = x_raw / jnp.linalg.norm(x_raw, axis=-1, keepdims=True)
        u = 0.1 * jax.random.normal(ku, shape, dtype=jnp.float32)
        # Project u to the tangent space at x (usual usage), as input prep.
        u = u - jnp.sum(u * x, axis=-1, keepdims=True) * x
        return x, u

    cases = [
        (2, 64, 32),      # packed lane-dense path (g=4), single block
        (4, 2500, 32),    # packed path, multi-step grid with ragged tail
        (1, 1100, 256),   # general path (D >= 128), ragged grid
    ]
    keys = jax.random.split(key, len(cases))
    for k, shape in zip(keys, cases):
        x, u = make_inputs(k, shape)
        out = jax.block_until_ready(retraction(x, u))
        ref = _reference(x, u)
        assert out.shape == x.shape
        assert jnp.allclose(out, ref, atol=1e-5, rtol=1e-5), (
            f"mismatch vs reference for shape {shape}")

    print("KERNEL_OK")
</pallas_src>

<mosaic_0001>
module attributes {stable_mosaic.version = 11 : i64} {
  func.func @_retraction_kernel_packed(%arg0: i32, %arg1: memref<32x128xf32, #tpu.memory_space<vmem>>, %arg2: memref<32x128xf32, #tpu.memory_space<vmem>>, %arg3: memref<128x128xf32, #tpu.memory_space<vmem>>, %arg4: memref<32x128xf32, #tpu.memory_space<vmem>>) attributes {dimension_semantics = [#tpu.dimension_semantics<parallel>], iteration_bounds = array<i64: 1>, scalar_prefetch = 0 : i64, scratch_operands = 0 : i64, tpu.core_type = #tpu.core_type<tc>, window_params = [{transform_indices = @transform_0, window_bounds = array<i64: 32, 128>}, {transform_indices = @transform_1, window_bounds = array<i64: 32, 128>}, {pipeline_mode = #tpu.pipeline_mode<synchronous>, transform_indices = @transform_2, window_bounds = array<i64: 128, 128>}, {transform_indices = @transform_3, window_bounds = array<i64: 32, 128>}]} {
    %c0 = arith.constant 0 : index
    %c0_0 = arith.constant 0 : index
    %0 = vector.load %arg1[%c0, %c0_0] : memref<32x128xf32, #tpu.memory_space<vmem>>, vector<32x128xf32>
    %c0_1 = arith.constant 0 : index
    %c0_2 = arith.constant 0 : index
    %1 = vector.load %arg2[%c0_1, %c0_2] : memref<32x128xf32, #tpu.memory_space<vmem>>, vector<32x128xf32>
    %2 = arith.addf %0, %1 : vector<32x128xf32>
    %3 = arith.mulf %2, %2 : vector<32x128xf32>
    %4 = arith.truncf %3 : vector<32x128xf32> to vector<32x128xbf16>
    %5 = arith.extf %4 : vector<32x128xbf16> to vector<32x128xf32>
    %6 = arith.subf %3, %5 : vector<32x128xf32>
    %c0_3 = arith.constant 0 : index
    %c0_4 = arith.constant 0 : index
    %7 = vector.load %arg3[%c0_3, %c0_4] : memref<128x128xf32, #tpu.memory_space<vmem>>, vector<128x128xf32>
    %cst = arith.constant dense<0.000000e+00> : vector<32x128xf32>
    %8 = tpu.matmul %5, %7, %cst {dimension_numbers = #tpu.dot_dimension_numbers<[1], [0], [0], [1], [0, 0, 1, 1], [], []>} : vector<32x128xf32>, vector<128x128xf32>, vector<32x128xf32> -> vector<32x128xf32>
    %cst_5 = arith.constant dense<0.000000e+00> : vector<32x128xf32>
    %9 = tpu.matmul %6, %7, %cst_5 {dimension_numbers = #tpu.dot_dimension_numbers<[1], [0], [0], [1], [0, 0, 1, 1], [], []>} : vector<32x128xf32>, vector<128x128xf32>, vector<32x128xf32> -> vector<32x128xf32>
    %10 = arith.addf %8, %9 : vector<32x128xf32>
    %cst_6 = arith.constant 1.000000e-30 : f32
    %11 = vector.broadcast %cst_6 : f32 to vector<32x128xf32>
    %12 = arith.maximumf %10, %11 : vector<32x128xf32>
    %13 = math.rsqrt %12 : vector<32x128xf32>
    %14 = arith.mulf %2, %13 : vector<32x128xf32>
    %c0_7 = arith.constant 0 : index
    %c0_8 = arith.constant 0 : index
    %15 = vector.load %arg4[%c0_7, %c0_8] : memref<32x128xf32, #tpu.memory_space<vmem>>, vector<32x128xf32>
    tpu.vector_store %arg4[%c0_7, %c0_8], %14 {strides = array<i32>} : memref<32x128xf32, #tpu.memory_space<vmem>>, vector<32x128xf32>,
    return
  }
  func.func @transform_0(%arg0: i32) -> (i32, i32) {
    %c0_i32 = arith.constant 0 : i32
    %c0_i32_0 = arith.constant 0 : i32
    return %arg0, %c0_i32 : i32, i32
  }
  func.func @transform_1(%arg0: i32) -> (i32, i32) {
    %c0_i32 = arith.constant 0 : i32
    %c0_i32_0 = arith.constant 0 : i32
    return %arg0, %c0_i32 : i32, i32
  }
  func.func @transform_2(%arg0: i32) -> (i32, i32) {
    %c0_i32 = arith.constant 0 : i32
    %c0_i32_0 = arith.constant 0 : i32
    %c0_i32_1 = arith.constant 0 : i32
    return %c0_i32, %c0_i32_0 : i32, i32
  }
  func.func @transform_3(%arg0: i32) -> (i32, i32) {
    %c0_i32 = arith.constant 0 : i32
    %c0_i32_0 = arith.constant 0 : i32
    return %arg0, %c0_i32 : i32, i32
  }
}

</mosaic_0001>

<bundles_post_ra>
// kernel: tpu_custom_call.1
= control target key start
LH: loop header
LB: loop body
LE: loop exit
PB: predicated region body
PF: predicated region fallthrough
CT: control target
= control target key end

     0   :  { %8 = vsyncpa [#allocation3], 0  ;;  %s707_s0 = inlined_call_operand.hbm [shape: f32[32,128], index: 0, kind: input, shape index: {}]   ;;  %s708_s1 = inlined_call_operand.hbm [shape: f32[32,128], index: 1, kind: input, shape index: {}]   ;;  %s709_s2 = inlined_call_operand.hbm [shape: f32[128,128], index: 2, kind: input, shape index: {}]   ;;  %s710_s3 = inlined_call_operand.hbm [shape: f32[32,128], index: 3, kind: output, shape index: {}]  }
   0x1   :  { %9 = vsyncpa [#allocation6], 0 }
   0x2   :  { %10 = vsyncpa [#allocation4], 0  ;;  %s594_s12 = smov [#allocation5]   ;;  %s595_s14 = smov [#allocation2]  }
   0x3   :  { %s28_s13 = sshll.u32 %s594_s12, 4  ;;  %s16_s15 = sshll.u32 %s595_s14, 4  ;;  %s29_s13 = int_to_ptr.vmem [resolvable:$true] %s28_s13  ;;  %s620_s15 = int_to_ptr.vmem [resolvable:$true] %s16_s15 }
   0x4   :  { %s500_s18 = scalar_lea.hbm %s708_s1, 512 }
   0x5   :  { %p501_p0 = scmp.ne.s32.totalorder %s708_s1, %s500_s18  ;;  %p504_p1 = scmp.lt.u32.totalorder %s500_s18, %s708_s1 }
   0x7   :  { %p506_p2 = pnand %p504_p1, %p501_p0 }
   0x9   :  { %509 = shalt.err (!%p506_p2)
}
   0xa   :  { %s510_s23 = scalar_lea.vmem %s29_s13, 512  ;;  %p515_p4 = scmp.lt.s32.totalorder %s29_s13, %s29_s13 }
   0xb   :  { %p511_p3 = scmp.ne.s32.totalorder %s29_s13, %s510_s23  ;;  %p516_p5 = scmp.lt.s32.totalorder %s510_s23, %s510_s23 }
   0xd   :  { %p517_p6 = por %p516_p5, %p515_p4 }
   0xf   :  { %p518_p7 = pnand %p517_p6, %p511_p3 }
  0x11   :  { %521 = shalt.err (!%p518_p7)
}
  0x12   :  { %s596_s24 = smov 128   ;;  %s597_s25 = smov 8  }
  0x13   :  { %34 = dma.hbm_to_vmem [thread:$0]  %s708_s1, 512, %s29_s13, [#allocation6], %s596_s24, %s596_s24, %s597_s25  }
  0x14   :  { %s522_s30 = scalar_lea.hbm %s707_s0, 512 }
  0x15   :  { %p523_p8 = scmp.ne.s32.totalorder %s707_s0, %s522_s30  ;;  %p526_p9 = scmp.lt.u32.totalorder %s522_s30, %s707_s0 }
  0x17   :  { %p528_p10 = pnand %p526_p9, %p523_p8 }
  0x19   :  { %531 = shalt.err (!%p528_p10)
}
  0x1a   :  { %s532_s8 = scalar_lea.vmem %s620_s15, 512  ;;  %p537_p12 = scmp.lt.s32.totalorder %s620_s15, %s620_s15 }
  0x1b   :  { %p533_p11 = scmp.ne.s32.totalorder %s620_s15, %s532_s8  ;;  %p538_p13 = scmp.lt.s32.totalorder %s532_s8, %s532_s8 }
  0x1d   :  { %p539_p0 = por %p538_p13, %p537_p12 }
  0x1f   :  { %p540_p1 = pnand %p539_p0, %p533_p11 }
  0x21   :  { %543 = shalt.err (!%p540_p1)
}
  0x22   :  { %22 = dma.hbm_to_vmem [thread:$0]  %s707_s0, 512, %s620_s15, [#allocation3], %s596_s24, %s596_s24, %s597_s25  }
  0x23   :  { %s598_s10 = smov [#allocation7]   ;;  %s544_s14 = scalar_lea.hbm %s709_s2, 2048 }
  0x24   :  { %s40_s11 = sshll.u32 %s598_s10, 4  ;;  %p545_p2 = scmp.ne.s32.totalorder %s709_s2, %s544_s14  ;;  %s41_s11 = int_to_ptr.vmem [resolvable:$true] %s40_s11 }
  0x25   :  { %p548_p3 = scmp.lt.u32.totalorder %s544_s14, %s709_s2 }
  0x27   :  { %p550_p4 = pnand %p548_p3, %p545_p2 }
  0x29   :  { %553 = shalt.err (!%p550_p4)
}
  0x2a   :  { %s554_s20 = scalar_lea.vmem %s41_s11, 2048  ;;  %p559_p6 = scmp.lt.s32.totalorder %s41_s11, %s41_s11 }
  0x2b   :  { %p555_p5 = scmp.ne.s32.totalorder %s41_s11, %s554_s20  ;;  %p560_p7 = scmp.lt.s32.totalorder %s554_s20, %s554_s20 }
  0x2d   :  { %p561_p8 = por %p560_p7, %p559_p6 }
  0x2f   :  { %p562_p9 = pnand %p561_p8, %p555_p5 }
  0x31   :  { %565 = shalt.err (!%p562_p9)
}
  0x32   :  { %46 = dma.hbm_to_vmem [thread:$0]  %s709_s2, 2048, %s41_s11, [#allocation6], %s596_s24, %s596_s24, %s597_s25  }
  0x33   :  { %588 = dma.done.wait [#allocation3], 512  }
  0x34   :  { %589 = vsyncadd [#allocation3], 4294966784 }
  0x35   :  { %590 = dma.done.wait [#allocation6], 2560  }
  0x36   :  { %591 = vsyncadd [#allocation6], 4294964736  ;;  %v82_v0 = vld [vmem:[#allocation7] sm:$0xff]  ;;  %v83_v1 = vld [vmem:[#allocation7 + $0x8] sm:$0xff]  ;;  %s599_s2 = smov [#allocation8]  }
  0x37   :  { %v84_v2 = vld [vmem:[#allocation7 + $0x10] sm:$0xff]  ;;  %v418_v3 = vpack.c.bf16 %v83_v1, %v82_v0  ;;  %v85_v4 = vld [vmem:[#allocation7 + $0x18] sm:$0xff]  ;;  %v86_v6 = vld [vmem:[#allocation7 + $0x20] sm:$0xff]  ;;  %s289_s21 = sshll.u32 %s599_s2, 4  ;;  %s290_s21 = int_to_ptr.vmem [resolvable:$true] %s289_s21 }
  0x38   :  { %v422_v5 = vpack.c.bf16 %v85_v4, %v84_v2  ;;  %v87_v7 = vld [vmem:[#allocation7 + $0x28] sm:$0xff]  ;;  %v88_v9 = vld [vmem:[#allocation7 + $0x30] sm:$0xff]  ;;  %v56_v10 = vld [vmem:[#allocation2] sm:$0xff]  ;;  %s566_s22 = scalar_lea.vmem %s290_s21, 512  ;;  %p571_p11 = scmp.lt.s32.totalorder %s290_s21, %s290_s21 }
  0x39   :  { %419 = vmatprep.subr.bf16.mxu1 %v418_v3  ;;  %451 = vmatprep.subr.bf16.mxu0 %v418_v3  ;;  %v426_v8 = vpack.c.bf16 %v87_v7, %v86_v6  ;;  %v57_v11 = vld [vmem:[#allocation2 + $0x8] sm:$0xff]  ;;  %v89_v12 = vld [vmem:[#allocation7 + $0x38] sm:$0xff]  ;;  %v60_v13 = vld [vmem:[#allocation5] sm:$0xff]  ;;  %p567_p10 = scmp.ne.s32.totalorder %s290_s21, %s566_s22  ;;  %p572_p12 = scmp.lt.s32.totalorder %s566_s22, %s566_s22 }
  0x3a   :  { %421 = vmatpush3.bf16.msra.mxu1 %v418_v3  ;;  %453 = vmatpush3.bf16.msra.mxu0 %v418_v3  ;;  %v61_v14 = vld [vmem:[#allocation5 + $0x8] sm:$0xff]  ;;  %v672_v15 = vadd.f32 %v60_v13, %v56_v10  ;;  %v430_v17 = vpack.c.bf16 %v89_v12, %v88_v9  ;;  %v90_v20 = vld [vmem:[#allocation7 + $0x40] sm:$0xff]  ;;  %v58_v23 = vld [vmem:[#allocation2 + $0x10] sm:$0xff] }
  0x3b   :  { %423 = vmatprep.subr.bf16.mxu1 %v422_v5  ;;  %455 = vmatprep.subr.bf16.mxu0 %v422_v5  ;;  %v674_v16 = vadd.f32 %v61_v14, %v57_v11  ;;  %v91_v21 = vld [vmem:[#allocation7 + $0x48] sm:$0xff]  ;;  %v59_v26 = vld [vmem:[#allocation2 + $0x18] sm:$0xff]  ;;  %v62_v27 = vld [vmem:[#allocation5 + $0x10] sm:$0xff]  ;;  %p573_p13 = por %p572_p12, %p571_p11 }
  0x3c   :  { %v68_v18 = vmul.f32 %v672_v15, %v672_v15  ;;  %v434_v24 = vpack.c.bf16 %v91_v21, %v90_v20  ;;  %v63_v28 = vld [vmem:[#allocation5 + $0x18] sm:$0xff]  ;;  %v92_v29 = vld [vmem:[#allocation7 + $0x50] sm:$0xff]  ;;  %v680_v32 = vadd.f32 %v62_v27, %v58_v23  ;;  %v94_v35 = vld [vmem:[#allocation7 + $0x60] sm:$0xff] }
  0x3d   :  { %v69_v19 = vmul.f32 %v674_v16, %v674_v16  ;;  %v93_v30 = vld [vmem:[#allocation7 + $0x58] sm:$0xff]  ;;  %v682_v33 = vadd.f32 %v63_v28, %v59_v26  ;;  %v95_v36 = vld [vmem:[#allocation7 + $0x68] sm:$0xff]  ;;  %v96_v40 = vld [vmem:[#allocation7 + $0x70] sm:$0xff]  ;;  %p574_p0 = pnand %p573_p13, %p567_p10 }
  0x3e   :  { %425 = vmatpush3.bf16.msra.mxu1 %v422_v5  ;;  %457 = vmatpush3.bf16.msra.mxu0 %v422_v5  ;;  %v438_v34 = vpack.c.bf16 %v93_v30, %v92_v29  ;;  %v70_v37 = vmul.f32 %v680_v32, %v680_v32  ;;  %v442_v39 = vpack.c.bf16 %v95_v36, %v94_v35  ;;  %v97_v41 = vld [vmem:[#allocation7 + $0x78] sm:$0xff] }
  0x3f   :  { %427 = vmatprep.subr.bf16.mxu1 %v426_v8  ;;  %459 = vmatprep.subr.bf16.mxu0 %v426_v8  ;;  %v72_v22 = vpack.c.bf16 %v69_v19, %v68_v18  ;;  %v71_v38 = vmul.f32 %v682_v33, %v682_v33  ;;  %v446_v43 = vpack.c.bf16 %v97_v41, %v96_v40 }
  0x41   :  { %v74_v25 = vunpack.c.l.bf16 %v72_v22  ;;  %v73_v42 = vpack.c.bf16 %v71_v38, %v70_v37  ;;  %v75_v44 = vunpack.c.h.bf16 %v72_v22 }
  0x42   :  { %429 = vmatpush3.bf16.msra.mxu1 %v426_v8  ;;  %461 = vmatpush3.bf16.msra.mxu0 %v426_v8 }
  0x43   :  { %431 = vmatprep.subr.bf16.mxu1 %v430_v17  ;;  %463 = vmatprep.subr.bf16.mxu0 %v430_v17  ;;  %v78_v31 = vsub.f32 %v68_v18, %v74_v25  ;;  %v76_v45 = vunpack.c.l.bf16 %v73_v42  ;;  %v79_v46 = vsub.f32 %v69_v19, %v75_v44  ;;  %v77_v47 = vunpack.c.h.bf16 %v73_v42 }
  0x44   :  { %412 = vmatprep.mubr.f32.mxu0 %v74_v25 }
  0x45   :  { %374 = vmatprep.mubr.f32.mxu1 %v78_v31  ;;  %v80_v48 = vsub.f32 %v70_v37, %v76_v45  ;;  %v81_v49 = vsub.f32 %v71_v38, %v77_v47 }
  0x46   :  { %433 = vmatpush3.bf16.msra.mxu1 %v430_v17  ;;  %465 = vmatpush3.bf16.msra.mxu0 %v430_v17 }
  0x47   :  { %435 = vmatprep.subr.bf16.mxu1 %v434_v24  ;;  %467 = vmatprep.subr.bf16.mxu0 %v434_v24 }
  0x4a   :  { %437 = vmatpush3.bf16.msra.mxu1 %v434_v24  ;;  %469 = vmatpush3.bf16.msra.mxu0 %v434_v24 }
  0x4b   :  { %439 = vmatprep.subr.bf16.mxu1 %v438_v34  ;;  %471 = vmatprep.subr.bf16.mxu0 %v438_v34 }
  0x4e   :  { %441 = vmatpush3.bf16.msra.mxu1 %v438_v34  ;;  %473 = vmatpush3.bf16.msra.mxu0 %v438_v34 }
  0x4f   :  { %443 = vmatprep.subr.bf16.mxu1 %v442_v39  ;;  %475 = vmatprep.subr.bf16.mxu0 %v442_v39 }
  0x52   :  { %445 = vmatpush3.bf16.msra.mxu1 %v442_v39  ;;  %477 = vmatpush3.bf16.msra.mxu0 %v442_v39 }
  0x53   :  { %447 = vmatprep.subr.bf16.mxu1 %v446_v43  ;;  %479 = vmatprep.subr.bf16.mxu0 %v446_v43 }
  0x56   :  { %449 = vmatpush3.bf16.msra.mxu1 %v446_v43  ;;  %481 = vmatpush3.bf16.msra.mxu0 %v446_v43 }
  0x59   :  { %375 = vmatmul.mubr.f32.vlgmr.msra.gmra.mrb[0].mxu1 %v79_v46  ;;  %413 = vmatmul.mubr.f32.vlgmr.msra.gmra.mrb[0].mxu0 %v75_v44 }
  0x5a   :  { %377 = vmatprep.mubr.f32.mxu1 %v80_v48  ;;  %415 = vmatprep.mubr.f32.mxu0 %v76_v45 }
  0x5d   :  { %378 = vmatmul.mubr.f32.gmra.mrb[2].mxu1 %v81_v49  ;;  %416 = vmatmul.mubr.f32.gmra.mrb[2].mxu0 %v77_v47 }
 0x12c   :  { %v376_v50 = vpop.f32.mrb[0].mxu1  ;;  %v414_v51 = vpop.f32.mrb[0].mxu0 }
 0x12d   :  { %v255_v52 = vadd.f32 %v414_v51, %v376_v50  ;;  %v164_v53 = vpop.f32.mrb[1].mxu1  ;;  %v249_v54 = vpop.f32.mrb[1].mxu0 }
 0x12e   :  { %v250_v55 = vadd.f32 %v249_v54, %v164_v53 }
 0x12f   :  { %v269_v56 = vmax.f32 %v255_v52, 1e-30 }
 0x130   :  { %v268_v57 = vmax.f32 %v250_v55, 1e-30  ;;  %v379_v58 = vpop.f32.mrb[2].mxu1  ;;  %v417_v59 = vpop.f32.mrb[2].mxu0 }
 0x131   :  { %492 = vrsqrt.f32 %v269_v56  ;;  %v265_v60 = vadd.f32 %v417_v59, %v379_v58  ;;  %v174_v61 = vpop.f32.mrb[3].mxu1  ;;  %v259_v62 = vpop.f32.mrb[3].mxu0 }
 0x132   :  { %494 = vrsqrt.f32 %v268_v57  ;;  %v260_v63 = vadd.f32 %v259_v62, %v174_v61 }
 0x133   :  { %v271_v0 = vmax.f32 %v265_v60, 1e-30 }
 0x134   :  { %v270_v1 = vmax.f32 %v260_v63, 1e-30 }
 0x135   :  { %496 = vrsqrt.f32 %v271_v0 }
 0x136   :  { %498 = vrsqrt.f32 %v270_v1 }
 0x13b   :  { %v493_v2 = vpop.eup %492 }
 0x13c   :  { %v495_v3 = vpop.eup %494  ;;  %v277_v4 = vmul.f32 %v493_v2, %v674_v16 }
 0x13d   :  { %v276_v5 = vmul.f32 %v495_v3, %v672_v15 }
 0x13e   :  { %281 = vst [vmem:[#allocation8 + $0x8] sm:$0xff] %v277_v4 }
 0x13f   :  { %v497_v6 = vpop.eup %496  ;;  %280 = vst [vmem:[#allocation8] sm:$0xff] %v276_v5 }
 0x140   :  { %v499_v7 = vpop.eup %498  ;;  %v279_v8 = vmul.f32 %v497_v6, %v682_v33 }
 0x141   :  { %v278_v9 = vmul.f32 %v499_v7, %v680_v32 }
 0x142   :  { %283 = vst [vmem:[#allocation8 + $0x18] sm:$0xff] %v279_v8 }
 0x143   :  { %282 = vst [vmem:[#allocation8 + $0x10] sm:$0xff] %v278_v9 }
 0x144   :  { %577 = shalt.err (!%p574_p0)
}
 0x145   :  { %s578_s27 = scalar_lea.hbm %s710_s3, 512 }
 0x146   :  { %p579_p1 = scmp.ne.s32.totalorder %s710_s3, %s578_s27  ;;  %p582_p2 = scmp.lt.u32.totalorder %s578_s27, %s710_s3 }
 0x148   :  { %p584_p3 = pnand %p582_p2, %p579_p1 }
 0x14a   :  { %587 = shalt.err (!%p584_p3)
}
 0x14b   :  { %295 = dma.vmem_to_hbm [thread:$0]  %s290_s21, 512, %s710_s3, [#allocation4], %s596_s24, %s596_s24, %s597_s25  }
 0x14c   :  { %592 = dma.done.wait [#allocation4], 512  }
 0x14d   :  { %593 = vsyncadd [#allocation4], 4294966784 }
 0x14e   :  { %299 = vsyncpa [#allocation3], 1 }
 0x14f   :  { %300 = vsyncpa [#allocation6], 1 }
 0x150   :  { %301 = vsyncpa [#allocation4], 1 }

</bundles_post_ra>
